<compile_context>
chip_gen: v7x
topology: tpu7x:2x2x1
jax: 0.10.0
libtpu: 0.0.40
codegen_flags: <defaults>
</compile_context>

<pallas_src>
import numpy as np
import jax
import jax.numpy as jnp
from jax import lax
from jax.experimental import pallas as pl
from jax.experimental.pallas import tpu as pltpu

_F32 = jnp.float32
_BF16 = jnp.bfloat16


def _row_tile(m, cap=256, min_steps=2):
    """Largest multiple-of-8 divisor of m (<= cap) giving a grid of >= min_steps."""
    best = None
    t = 8
    while t <= min(m, cap):
        if m % t == 0 and (m // t) >= min_steps:
            best = t
        t += 8
    if best is None:
        t = 8
        while t <= min(m, cap):
            if m % t == 0:
                best = t
            t += 8
    return best if best is not None else m


def _erf(x):
    """Abramowitz & Stegun 7.1.26 polynomial erf (max abs err 1.5e-7), f32 VPU/EUP ops."""
    a1, a2, a3, a4, a5 = 0.254829592, -0.284496736, 1.421413741, -1.453152027, 1.061405429
    p = 0.3275911
    s = jnp.where(x >= 0.0, 1.0, -1.0)
    z = jnp.abs(x)
    t = 1.0 / (1.0 + p * z)
    poly = ((((a5 * t + a4) * t + a3) * t + a2) * t + a1) * t
    return s * (1.0 - poly * jnp.exp(-z * z))


# ----------------------------------------------------------------------------
# Pallas kernel: plain Linear (bf16 operands on the MXU, f32 accumulate)
# ----------------------------------------------------------------------------
def _linear_kernel(x_ref, w_ref, b_ref, o_ref):
    acc = jnp.dot(x_ref[...].astype(_BF16), w_ref[...],
                  preferred_element_type=jnp.float32)
    o_ref[...] = (acc + b_ref[...]).astype(o_ref.dtype)


def linear(x, w, b):
    lead = x.shape[:-1]
    k = x.shape[-1]
    n = w.shape[1]
    x2 = x.reshape(-1, k)
    m = x2.shape[0]
    tm = _row_tile(m)
    y = pl.pallas_call(
        _linear_kernel,
        out_shape=jax.ShapeDtypeStruct((m, n), jnp.float32),
        grid=(m // tm,),
        in_specs=[
            pl.BlockSpec((tm, k), lambda i: (i, 0)),
            pl.BlockSpec((k, n), lambda i: (0, 0)),
            pl.BlockSpec((1, n), lambda i: (0, 0)),
        ],
        out_specs=pl.BlockSpec((tm, n), lambda i: (i, 0)),
        compiler_params=pltpu.CompilerParams(dimension_semantics=("parallel",)),
    )(x2, w, b.reshape(1, n))
    return y.reshape(*lead, n)


# ----------------------------------------------------------------------------
# Pallas kernel: fused LayerNorm(eps=1e-6) + Linear  (LN in f32, dot in bf16)
# ----------------------------------------------------------------------------
def _ln_linear_kernel(x_ref, g_ref, b_ref, w_ref, wb_ref, o_ref):
    x = x_ref[...].astype(jnp.float32)
    mean = jnp.mean(x, axis=-1, keepdims=True)
    xc = x - mean
    var = jnp.mean(xc * xc, axis=-1, keepdims=True)
    xn = xc * lax.rsqrt(var + 1e-6) * g_ref[...] + b_ref[...]
    acc = jnp.dot(xn.astype(_BF16), w_ref[...], preferred_element_type=jnp.float32)
    o_ref[...] = (acc + wb_ref[...]).astype(o_ref.dtype)


def ln_linear(x, g, b, w, wb):
    lead = x.shape[:-1]
    k = x.shape[-1]
    n = w.shape[1]
    x2 = x.reshape(-1, k)
    m = x2.shape[0]
    tm = _row_tile(m)
    y = pl.pallas_call(
        _ln_linear_kernel,
        out_shape=jax.ShapeDtypeStruct((m, n), jnp.float32),
        grid=(m // tm,),
        in_specs=[
            pl.BlockSpec((tm, k), lambda i: (i, 0)),
            pl.BlockSpec((1, k), lambda i: (0, 0)),
            pl.BlockSpec((1, k), lambda i: (0, 0)),
            pl.BlockSpec((k, n), lambda i: (0, 0)),
            pl.BlockSpec((1, n), lambda i: (0, 0)),
        ],
        out_specs=pl.BlockSpec((tm, n), lambda i: (i, 0)),
        compiler_params=pltpu.CompilerParams(dimension_semantics=("parallel",)),
    )(x2, g.reshape(1, k), b.reshape(1, k), w, wb.reshape(1, n))
    return y.reshape(*lead, n)


# ----------------------------------------------------------------------------
# Pallas kernel: fused  out = q + fc2(GELU(dwconv3x3(fc1(LayerNorm(q)))))
# Depthwise conv is done in token space: the (dy, dx) tap of token t (row-major
# inside a pyramid level of width w_l) is token t + dy*w_l + dx; row validity is
# handled by range clamping, column wrap by a precomputed (N, 3) mask.
# ----------------------------------------------------------------------------
def _make_conv_ffn_kernel(levels):
    def kernel(q_ref, g_ref, b_ref, w1_ref, b1_ref, k_ref, kb_ref, cm_ref,
               w2_ref, b2_ref, o_ref, hid_ref, acc_ref, act_ref):
        q = q_ref[0].astype(jnp.float32)                     # (N, C)
        # ffn_norm (LayerNorm, eps=1e-6)
        mean = jnp.mean(q, axis=-1, keepdims=True)
        xc = q - mean
        var = jnp.mean(xc * xc, axis=-1, keepdims=True)
        xn = xc * lax.rsqrt(var + 1e-6) * g_ref[...] + b_ref[...]
        # fc1
        hid_ref[...] = (jnp.dot(xn.astype(_BF16), w1_ref[...],
                                preferred_element_type=jnp.float32) + b1_ref[...])
        hid = hid_ref.shape[1]
        # depthwise 3x3, stride 1, pad 1, per pyramid level (zero padding)
        start = 0
        for (h_l, w_l) in levels:
            n_l = h_l * w_l
            acc_ref[0:n_l, :] = jnp.zeros((n_l, hid), jnp.float32)
            for dy in (-1, 0, 1):
                for dx in (-1, 0, 1):
                    shift = dy * w_l + dx
                    t0 = max(0, -shift)
                    t1 = min(n_l, n_l - shift)
                    tap = hid_ref[start + t0 + shift:start + t1 + shift, :]
                    tap = tap * k_ref[dy + 1, dx + 1:dx + 2, :]
                    if dx != 0:
                        tap = tap * cm_ref[start + t0:start + t1, dx + 1:dx + 2]
                    acc_ref[t0:t1, :] += tap
            act_ref[start:start + n_l, :] = acc_ref[0:n_l, :] + kb_ref[...]
            start += n_l
        # exact (erf) GELU, then fc2 and residual add
        a = act_ref[...]
        a = a * 0.5 * (1.0 + _erf(a * 0.7071067811865476))
        y = jnp.dot(a.astype(_BF16), w2_ref[...],
                    preferred_element_type=jnp.float32) + b2_ref[...]
        o_ref[0] = (q + y).astype(o_ref.dtype)
    return kernel


def conv_ffn_residual(p, ln_g, ln_b, x, H, W):
    """Returns x + ConvFFN(ffn_norm(x)) in a single pallas_call (grid over batch)."""
    B, N, C = x.shape
    hid = p['fc1_w'].shape[1]
    levels = ((2 * H, 2 * W), (H, W), (H // 2, W // 2))
    assert sum(h * w for h, w in levels) == N
    # Host-side column-validity masks for dx = -1 / 0 / +1 taps (per token).
    cm = []
    for (h_l, w_l) in levels:
        col = np.arange(h_l * w_l) % w_l
        cm.append(np.stack([col >= 1, np.ones_like(col, bool), col <= w_l - 2], axis=-1))
    colmask = jnp.asarray(np.concatenate(cm, axis=0).astype(np.float32))
    n_max = max(h * w for h, w in levels)

    return pl.pallas_call(
        _make_conv_ffn_kernel(levels),
        out_shape=jax.ShapeDtypeStruct((B, N, C), x.dtype),
        grid=(B,),
        in_specs=[
            pl.BlockSpec((1, N, C), lambda b: (b, 0, 0)),
            pl.BlockSpec((1, C), lambda b: (0, 0)),
            pl.BlockSpec((1, C), lambda b: (0, 0)),
            pl.BlockSpec((C, hid), lambda b: (0, 0)),
            pl.BlockSpec((1, hid), lambda b: (0, 0)),
            pl.BlockSpec((3, 3, hid), lambda b: (0, 0, 0)),
            pl.BlockSpec((1, hid), lambda b: (0, 0)),
            pl.BlockSpec((N, 3), lambda b: (0, 0)),
            pl.BlockSpec((hid, C), lambda b: (0, 0)),
            pl.BlockSpec((1, C), lambda b: (0, 0)),
        ],
        out_specs=pl.BlockSpec((1, N, C), lambda b: (b, 0, 0)),
        scratch_shapes=[
            pltpu.VMEM((N, hid), jnp.float32),      # fc1 output
            pltpu.VMEM((n_max, hid), jnp.float32),  # per-level conv accumulator
            pltpu.VMEM((N, hid), jnp.float32),      # conv(+bias) output before GELU/fc2
        ],
        compiler_params=pltpu.CompilerParams(dimension_semantics=("parallel",)),
    )(x, ln_g.reshape(1, C), ln_b.reshape(1, C),
      p['fc1_w'], p['fc1_b'].reshape(1, hid),
      p['dw_k'], p['dw_b'].reshape(1, hid),
      colmask, p['fc2_w'], p['fc2_b'].reshape(1, C))


# ----------------------------------------------------------------------------
# MSDeformAttn core: bilinear sampling as a one-hot weight matmul (no gathers).
# TODO(synk): move the per-level one-hot matmul into a Pallas kernel with the
#             (HW, D) value block resident in VMEM.
# ----------------------------------------------------------------------------
def ms_deform_attn_core(value, spatial_shapes, sampling_locations, attention_weights):
    B, S, M, D = value.shape
    _, Lq = sampling_locations.shape[:2]
    P = sampling_locations.shape[4]
    sizes = [h * w for h, w in spatial_shapes]
    starts = np.concatenate([[0], np.cumsum(sizes)]).astype(int)
    out = jnp.zeros((B, M, Lq, D), _F32)
    for lid, (H_, W_) in enumerate(spatial_shapes):
        HW = H_ * W_
        v_l = jnp.transpose(value[:, starts[lid]:starts[lid] + HW], (0, 2, 1, 3))  # (B,M,HW,D)
        loc = jnp.transpose(sampling_locations[:, :, :, lid], (0, 2, 1, 3, 4))     # (B,M,Lq,P,2)
        aw = jnp.transpose(attention_weights[:, :, :, lid], (0, 2, 1, 3))          # (B,M,Lq,P)
        px = loc[..., 0] * W_ - 0.5          # align_corners=False pixel coords
        py = loc[..., 1] * H_ - 0.5
        x0 = jnp.floor(px)
        y0 = jnp.floor(py)
        corners = [
            (x0, y0, (x0 + 1.0 - px) * (y0 + 1.0 - py)),
            (x0 + 1.0, y0, (px - x0) * (y0 + 1.0 - py)),
            (x0, y0 + 1.0, (x0 + 1.0 - px) * (py - y0)),
            (x0 + 1.0, y0 + 1.0, (px - x0) * (py - y0)),
        ]
        idx_list, w_list = [], []
        for cx, cy, cw in corners:
            inb = ((cx >= 0) & (cx <= W_ - 1) & (cy >= 0) & (cy <= H_ - 1)).astype(_F32)
            xi = jnp.clip(cx, 0, W_ - 1).astype(jnp.int32)
            yi = jnp.clip(cy, 0, H_ - 1).astype(jnp.int32)
            idx_list.append(yi * W_ + xi)
            w_list.append(cw * inb * aw)
        idx = jnp.stack(idx_list, axis=-1).reshape(B, M, Lq, P * 4)   # (B,M,Lq,4P)
        wts = jnp.stack(w_list, axis=-1).reshape(B, M, Lq, P * 4)
        iota = jnp.arange(HW, dtype=jnp.int32)
        onehot = (idx[..., None] == iota).astype(_F32)                # (B,M,Lq,4P,HW)
        A = jnp.sum(wts[..., None] * onehot, axis=-2)                 # (B,M,Lq,HW)
        out = out + jnp.einsum('bmqh,bmhd->bmqd', A, v_l)             # MXU
    return jnp.transpose(out, (0, 2, 1, 3)).reshape(B, Lq, M * D)


def ms_deform_attn(p, qn_g, qn_b, fn_g, fn_b,
                   query, reference_points, feat, spatial_shapes, level_start_index):
    del level_start_index  # only needed by the fused CUDA kernel, not the math
    B, Lq, C = query.shape
    _, Lin, _ = feat.shape
    M, L, P = p['n_heads'], p['n_levels'], p['n_points']
    D = p['d_value'] // M
    # query_norm + (sampling_offsets | attention_weights) in one fused kernel
    qp = ln_linear(query, qn_g, qn_b, p['qproj_w'], p['qproj_b'])
    n_off = M * L * P * 2
    offsets = qp[..., :n_off].reshape(B, Lq, M, L, P, 2)
    attn = jax.nn.softmax(qp[..., n_off:].reshape(B, Lq, M, L * P), axis=-1)
    attn = attn.reshape(B, Lq, M, L, P)
    # feat_norm + value_proj fused
    value = ln_linear(feat, fn_g, fn_b, p['value_proj_w'], p['value_proj_b'])
    value = value.reshape(B, Lin, M, D)
    ss = jnp.asarray(spatial_shapes, _F32)                  # (L, 2) = (H, W)
    normalizer = jnp.stack([ss[:, 1], ss[:, 0]], axis=-1)   # (L, 2) = (W, H)
    sampling_locations = (reference_points[:, :, None, :, None, :]
                          + offsets / normalizer[None, None, None, :, None, :])
    out = ms_deform_attn_core(value, spatial_shapes, sampling_locations, attn)
    return linear(out, p['output_proj_w'], p['output_proj_b'])


# ----------------------------------------------------------------------------
# Injector / Extractor / InteractionBlock
# ----------------------------------------------------------------------------
def injector_fwd(p, query, reference_points, feat, spatial_shapes, level_start_index):
    attn = ms_deform_attn(p['attn'], p['query_norm_g'], p['query_norm_b'],
                          p['feat_norm_g'], p['feat_norm_b'],
                          query, reference_points, feat, spatial_shapes, level_start_index)
    return query + p['gamma'] * attn


def extractor_fwd(p, query, reference_points, feat, spatial_shapes, level_start_index, H, W):
    attn = ms_deform_attn(p['attn'], p['query_norm_g'], p['query_norm_b'],
                          p['feat_norm_g'], p['feat_norm_b'],
                          query, reference_points, feat, spatial_shapes, level_start_index)
    query = query + attn
    # query + DropPath(0)(ConvFFN(ffn_norm(query))) — fused, residual included
    return conv_ffn_residual(p['ffn'], p['ffn_norm_g'], p['ffn_norm_b'], query, H, W)


def interaction_block_fwd(params, x, c, blocks, deform_inputs1, deform_inputs2, H, W):
    y = injector_fwd(params['injector'], x, deform_inputs1[0], c,
                     deform_inputs1[1], deform_inputs1[2])
    for blk in blocks:                 # backbone ViT blocks are external callables
        y = blk(y, H, W)
    c = extractor_fwd(params['extractor'], c, deform_inputs2[0], y,
                      deform_inputs2[1], deform_inputs2[2], H, W)
    # extra_extractor=False -> self.extra_extractors is None
    return x, c


# ----------------------------------------------------------------------------
# Deterministic parameter init (weights stored bf16 for the MXU path)
# ----------------------------------------------------------------------------
def _init_linear(key, fan_in, fan_out, scale=0.02):
    kw, kb = jax.random.split(key)
    return (jax.random.normal(kw, (fan_in, fan_out), _F32) * scale,
            jax.random.normal(kb, (fan_out,), _F32) * scale)


def init_msdeform_attn(key, d_model, n_levels, n_heads, n_points, ratio):
    d_value = int(d_model * ratio)
    assert d_value % n_heads == 0
    ks = jax.random.split(key, 4)
    so_w, so_b = _init_linear(ks[0], d_model, n_heads * n_levels * n_points * 2)
    aw_w, aw_b = _init_linear(ks[1], d_model, n_heads * n_levels * n_points)
    vp_w, vp_b = _init_linear(ks[2], d_model, d_value)
    op_w, op_b = _init_linear(ks[3], d_value, d_model)
    return dict(n_heads=n_heads, n_levels=n_levels, n_points=n_points, d_value=d_value,
                qproj_w=jnp.concatenate([so_w, aw_w], axis=1).astype(_BF16),
                qproj_b=jnp.concatenate([so_b, aw_b], axis=0),
                value_proj_w=vp_w.astype(_BF16), value_proj_b=vp_b,
                output_proj_w=op_w.astype(_BF16), output_proj_b=op_b)


def init_injector(key, dim, num_heads, n_points, deform_ratio, init_values=0.0):
    return dict(
        query_norm_g=jnp.ones((dim,), _F32), query_norm_b=jnp.zeros((dim,), _F32),
        feat_norm_g=jnp.ones((dim,), _F32), feat_norm_b=jnp.zeros((dim,), _F32),
        attn=init_msdeform_attn(key, dim, 3, num_heads, n_points, deform_ratio),
        gamma=init_values * jnp.ones((dim,), _F32))


def init_extractor(key, dim, num_heads, n_points, deform_ratio, cffn_ratio):
    hidden = int(dim * cffn_ratio)
    ka, k1, k2, kd = jax.random.split(key, 4)
    fc1_w, fc1_b = _init_linear(k1, dim, hidden)
    fc2_w, fc2_b = _init_linear(k2, hidden, dim)
    kdw, kdb = jax.random.split(kd)
    return dict(
        query_norm_g=jnp.ones((dim,), _F32), query_norm_b=jnp.zeros((dim,), _F32),
        feat_norm_g=jnp.ones((dim,), _F32), feat_norm_b=jnp.zeros((dim,), _F32),
        ffn_norm_g=jnp.ones((dim,), _F32), ffn_norm_b=jnp.zeros((dim,), _F32),
        attn=init_msdeform_attn(ka, dim, 1, num_heads, n_points, deform_ratio),
        ffn=dict(fc1_w=fc1_w.astype(_BF16), fc1_b=fc1_b,
                 fc2_w=fc2_w.astype(_BF16), fc2_b=fc2_b,
                 dw_k=jax.random.normal(kdw, (3, 3, hidden), _F32) * 0.02,
                 dw_b=jax.random.normal(kdb, (hidden,), _F32) * 0.02))


def get_reference_points(spatial_shapes):
    refs = []
    for (H_, W_) in spatial_shapes:
        ry = (jnp.arange(H_, dtype=_F32) + 0.5) / H_
        rx = (jnp.arange(W_, dtype=_F32) + 0.5) / W_
        yy, xx = jnp.meshgrid(ry, rx, indexing='ij')
        refs.append(jnp.stack([xx.reshape(-1), yy.reshape(-1)], axis=-1))
    return jnp.concatenate(refs, axis=0)[None, :, None, :]   # (1, sum(HW), 1, 2)


if __name__ == "__main__":
    dim, num_heads, n_points = 48, 6, 4
    B, H, W = 2, 8, 8

    key = jax.random.PRNGKey(0)
    kx, kc, kinj, kext = jax.random.split(key, 4)
    x = jax.random.normal(kx, (B, H * W, dim), _F32)                 # ViT tokens
    c = jax.random.normal(kc, (B, 21 * H * W // 4, dim), _F32)       # adapter pyramid tokens

    params = dict(
        injector=init_injector(kinj, dim, num_heads, n_points, deform_ratio=1.0,
                               init_values=0.0),
        extractor=init_extractor(kext, dim, num_heads, n_points, deform_ratio=1.0,
                                 cffn_ratio=0.25))

    # deform_inputs1: query = ViT tokens (H,W); feat = c pyramid (2H,2W),(H,W),(H/2,W/2)
    ss1 = ((2 * H, 2 * W), (H, W), (H // 2, W // 2))
    deform_inputs1 = (get_reference_points(((H, W),)), ss1, (0, 4 * H * W, 5 * H * W))
    # deform_inputs2: query = c pyramid; feat = ViT tokens at (H, W)
    ss2 = ((H, W),)
    deform_inputs2 = (get_reference_points(ss1), ss2, (0,))

    blocks = ()   # backbone ViT blocks are external inputs; none for this test

    x_out, c_out = interaction_block_fwd(params, x, c, blocks,
                                         deform_inputs1, deform_inputs2, H, W)
    jax.block_until_ready((x_out, c_out))
    assert x_out.shape == (B, H * W, dim)
    assert c_out.shape == (B, 21 * H * W // 4, dim)
    assert bool(jnp.all(jnp.isfinite(x_out))) and bool(jnp.all(jnp.isfinite(c_out)))
    print("KERNEL_OK")
</pallas_src>

<mosaic_0001>
module attributes {stable_mosaic.version = 11 : i64} {
  func.func @_ln_linear_kernel(%arg0: i32, %arg1: memref<64x48xf32, #tpu.memory_space<vmem>>, %arg2: memref<1x48xf32, #tpu.memory_space<vmem>>, %arg3: memref<1x48xf32, #tpu.memory_space<vmem>>, %arg4: memref<48x216xbf16, #tpu.memory_space<vmem>>, %arg5: memref<1x216xf32, #tpu.memory_space<vmem>>, %arg6: memref<64x216xf32, #tpu.memory_space<vmem>>) attributes {dimension_semantics = [#tpu.dimension_semantics<parallel>], iteration_bounds = array<i64: 2>, scalar_prefetch = 0 : i64, scratch_operands = 0 : i64, tpu.core_type = #tpu.core_type<tc>, window_params = [{transform_indices = @transform_0, window_bounds = array<i64: 64, 48>}, {pipeline_mode = #tpu.pipeline_mode<synchronous>, transform_indices = @transform_1, window_bounds = array<i64: 1, 48>}, {pipeline_mode = #tpu.pipeline_mode<synchronous>, transform_indices = @transform_2, window_bounds = array<i64: 1, 48>}, {pipeline_mode = #tpu.pipeline_mode<synchronous>, transform_indices = @transform_3, window_bounds = array<i64: 48, 216>}, {pipeline_mode = #tpu.pipeline_mode<synchronous>, transform_indices = @transform_4, window_bounds = array<i64: 1, 216>}, {transform_indices = @transform_5, window_bounds = array<i64: 64, 216>}]} {
    %c0 = arith.constant 0 : index
    %c0_0 = arith.constant 0 : index
    %0 = vector.load %arg1[%c0, %c0_0] : memref<64x48xf32, #tpu.memory_space<vmem>>, vector<64x48xf32>
    %cst = arith.constant dense<0.000000e+00> : vector<64xf32>
    %1 = vector.multi_reduction <add>, %0, %cst [1] : vector<64x48xf32> to vector<64xf32>
    %2 = vector.shape_cast %1 : vector<64xf32> to vector<64x1xf32>
    %cst_1 = arith.constant 4.800000e+01 : f32
    %3 = vector.broadcast %cst_1 : f32 to vector<64x1xf32>
    %4 = arith.divf %2, %3 : vector<64x1xf32>
    %5 = vector.broadcast %4 : vector<64x1xf32> to vector<64x48xf32>
    %6 = arith.subf %0, %5 : vector<64x48xf32>
    %7 = arith.mulf %6, %6 : vector<64x48xf32>
    %cst_2 = arith.constant dense<0.000000e+00> : vector<64xf32>
    %8 = vector.multi_reduction <add>, %7, %cst_2 [1] : vector<64x48xf32> to vector<64xf32>
    %9 = vector.shape_cast %8 : vector<64xf32> to vector<64x1xf32>
    %cst_3 = arith.constant 4.800000e+01 : f32
    %10 = vector.broadcast %cst_3 : f32 to vector<64x1xf32>
    %11 = arith.divf %9, %10 : vector<64x1xf32>
    %cst_4 = arith.constant 9.99999997E-7 : f32
    %12 = vector.broadcast %cst_4 : f32 to vector<64x1xf32>
    %13 = arith.addf %11, %12 : vector<64x1xf32>
    %14 = math.rsqrt %13 : vector<64x1xf32>
    %15 = vector.broadcast %14 : vector<64x1xf32> to vector<64x48xf32>
    %16 = arith.mulf %6, %15 : vector<64x48xf32>
    %c0_5 = arith.constant 0 : index
    %c0_6 = arith.constant 0 : index
    %17 = vector.load %arg2[%c0_5, %c0_6] : memref<1x48xf32, #tpu.memory_space<vmem>>, vector<1x48xf32>
    %18 = vector.broadcast %17 : vector<1x48xf32> to vector<64x48xf32>
    %19 = arith.mulf %16, %18 : vector<64x48xf32>
    %c0_7 = arith.constant 0 : index
    %c0_8 = arith.constant 0 : index
    %20 = vector.load %arg3[%c0_7, %c0_8] : memref<1x48xf32, #tpu.memory_space<vmem>>, vector<1x48xf32>
    %21 = vector.broadcast %20 : vector<1x48xf32> to vector<64x48xf32>
    %22 = arith.addf %19, %21 : vector<64x48xf32>
    %23 = arith.truncf %22 : vector<64x48xf32> to vector<64x48xbf16>
    %c0_9 = arith.constant 0 : index
    %c0_10 = arith.constant 0 : index
    %24 = vector.load %arg4[%c0_9, %c0_10] : memref<48x216xbf16, #tpu.memory_space<vmem>>, vector<48x216xbf16>
    %cst_11 = arith.constant dense<0.000000e+00> : vector<64x216xf32>
    %25 = tpu.matmul %23, %24, %cst_11 {dimension_numbers = #tpu.dot_dimension_numbers<[1], [0], [0], [1], [0, 0, 1, 1], [], []>} : vector<64x48xbf16>, vector<48x216xbf16>, vector<64x216xf32> -> vector<64x216xf32>
    %c0_12 = arith.constant 0 : index
    %c0_13 = arith.constant 0 : index
    %26 = vector.load %arg5[%c0_12, %c0_13] : memref<1x216xf32, #tpu.memory_space<vmem>>, vector<1x216xf32>
    %27 = vector.broadcast %26 : vector<1x216xf32> to vector<64x216xf32>
    %28 = arith.addf %25, %27 : vector<64x216xf32>
    %c0_14 = arith.constant 0 : index
    %c0_15 = arith.constant 0 : index
    %29 = vector.load %arg6[%c0_14, %c0_15] : memref<64x216xf32, #tpu.memory_space<vmem>>, vector<64x216xf32>
    tpu.vector_store %arg6[%c0_14, %c0_15], %28 {strides = array<i32>} : memref<64x216xf32, #tpu.memory_space<vmem>>, vector<64x216xf32>,
    return
  }
  func.func @transform_0(%arg0: i32) -> (i32, i32) {
    %c0_i32 = arith.constant 0 : i32
    %c0_i32_0 = arith.constant 0 : i32
    return %arg0, %c0_i32 : i32, i32
  }
  func.func @transform_1(%arg0: i32) -> (i32, i32) {
    %c0_i32 = arith.constant 0 : i32
    %c0_i32_0 = arith.constant 0 : i32
    %c0_i32_1 = arith.constant 0 : i32
    return %c0_i32, %c0_i32_0 : i32, i32
  }
  func.func @transform_2(%arg0: i32) -> (i32, i32) {
    %c0_i32 = arith.constant 0 : i32
    %c0_i32_0 = arith.constant 0 : i32
    %c0_i32_1 = arith.constant 0 : i32
    return %c0_i32, %c0_i32_0 : i32, i32
  }
  func.func @transform_3(%arg0: i32) -> (i32, i32) {
    %c0_i32 = arith.constant 0 : i32
    %c0_i32_0 = arith.constant 0 : i32
    %c0_i32_1 = arith.constant 0 : i32
    return %c0_i32, %c0_i32_0 : i32, i32
  }
  func.func @transform_4(%arg0: i32) -> (i32, i32) {
    %c0_i32 = arith.constant 0 : i32
    %c0_i32_0 = arith.constant 0 : i32
    %c0_i32_1 = arith.constant 0 : i32
    return %c0_i32, %c0_i32_0 : i32, i32
  }
  func.func @transform_5(%arg0: i32) -> (i32, i32) {
    %c0_i32 = arith.constant 0 : i32
    %c0_i32_0 = arith.constant 0 : i32
    return %arg0, %c0_i32 : i32, i32
  }
}

</mosaic_0001>

<bundles_post_ra>
// kernel: tpu_custom_call.1
= control target key start
LH: loop header
LB: loop body
LE: loop exit
PB: predicated region body
PF: predicated region fallthrough
CT: control target
= control target key end

     0   :  { %s691_s18 = smov 0   ;;  %s829_s0 = inlined_call_operand.vmem [shape: f32[128,48], index: 0, kind: input, shape index: {}]   ;;  %s830_s1 = inlined_call_operand.vmem [shape: f32[1,48], index: 1, kind: input, shape index: {}]   ;;  %s831_s2 = inlined_call_operand.vmem [shape: f32[1,48], index: 2, kind: input, shape index: {}]   ;;  %s832_s3 = inlined_call_operand.vmem [shape: bf16[48,216], index: 3, kind: input, shape index: {}]   ;;  %s833_s4 = inlined_call_operand.vmem [shape: f32[1,216], index: 4, kind: input, shape index: {}]   ;;  %s834_s5 = inlined_call_operand.vmem [shape: f32[128,216], index: 5, kind: output, shape index: {}]  }
   0x1 LB: > { %s587_s19 = sadd.s32 4294967295, %s658_s18   ;;  %p591_p0 = scmp.ge.s32.totalorder %s658_s18, 1  ;;  %s658_s18 = sphi %s691_s18, %s15_s18  }
   0x2   : > { %p188_p1 = scmp.lt.s32.totalorder %s658_s18, 3 }
   0x4   : > { %p189_p2 = pnand %p591_p0, %p188_p1 }
   0x5   : > { %s592_s20 = sshll.u32 (!%p189_p2), %s587_s19, 3  ;;  %vm239_vm0 = vcmask (!%p189_p2), 392192   ;;  %v627_v56 = vld [vmem:[%s832_s3 + $0x4] ss:$8 sps:$4 sm:$0xff] (!%p189_p2)   ;;  %v629_v57 = vld [vmem:[%s832_s3] ss:$8 sps:$4 sm:$0xff] (!%p189_p2)  }
   0x6   : > { %192 = sbr.rel (%p189_p2) target bundleno = 566 (0x236), region = 40  ;;  %p218_p3 = scmp.lt.s32.totalorder (!%p189_p2), %s592_s20, 15  ;;  %439 = vmatprep.subr.bf16.mxu0 (!%p189_p2), %v627_v56  ;;  %612 = vmatprep.subr.bf16.mxu1 (!%p189_p2), %v627_v56  ;;  %v630_v58 = vld [vmem:[%s832_s3 + $0x14] ss:$8 sps:$4 sm:$0xff] (!%p189_p2)   ;;  %v632_v59 = vld [vmem:[%s832_s3 + $0x10] ss:$8 sps:$4 sm:$0xff] (!%p189_p2)  }
   0x7   : > { %440 = vmatpush1.bf16.msra.mxu0 (!%p189_p2), %v629_v57  ;;  %615 = vmatpush1.bf16.msra.mxu1 (!%p189_p2), %v629_v57  ;;  %v633_v60 = vld [vmem:[%s832_s3 + $0x24] ss:$8 sps:$4 sm:$0xff] (!%p189_p2)   ;;  %v635_v61 = vld [vmem:[%s832_s3 + $0x20] ss:$8 sps:$4 sm:$0xff] (!%p189_p2)   ;;  %v660_v62 = vmov (!%p189_p2), 0   ;;  %vm513_vm1 = vcmask (!%p189_p2), 719872  }
   0x8   : > { %441 = vmatprep.subr.bf16.mxu0 (!%p189_p2), %v630_v58  ;;  %613 = vmatprep.subr.bf16.mxu1 (!%p189_p2), %v630_v58 }
   0x9   : > { %471 = vmatprep.mubr.bf16.mxu0 (!%p189_p2), %v660_v62  ;;  %491 = vmatprep.mubr.bf16.mxu1 (!%p189_p2), %v660_v62 }
   0xb   : > { %442 = vmatpush1.bf16.msra.mxu0 (!%p189_p2), %v632_v59  ;;  %616 = vmatpush1.bf16.msra.mxu1 (!%p189_p2), %v632_v59 }
   0xc   : > { %443 = vmatprep.subr.bf16.mxu0 (!%p189_p2), %v633_v60  ;;  %614 = vmatprep.subr.bf16.mxu1 (!%p189_p2), %v633_v60 }
   0xd   : > { %s836_s20 = smov (!%p218_p3, %s592_s20), 15 }
   0xe   : > { %s593_s21 = sshll.u32 %s836_s20, 3  ;;  %s611_s19 = sshll.u32 %s836_s20, 4 }
   0xf   : > { %s221_s24 = scalar_lea.vmem %s829_s0, %s593_s21  ;;  %444 = vmatpush1.bf16.msra.mxu0 %v635_v61  ;;  %617 = vmatpush1.bf16.msra.mxu1 %v635_v61  ;;  %s800_s23 = scalar_lea.vmem %s834_s5, %s611_s19 }
  0x10   : > { %v231_v0 = vld [vmem:[%s221_s24] sm:$0xff]  ;;  %v232_v2 = vld [vmem:[%s221_s24 + $0x8] sm:$0xff]  ;;  %v233_v8 = vld [vmem:[%s221_s24 + $0x10] sm:$0xff] }
  0x11   : > { %v235_v1 = vld [vmem:[%s221_s24 + $0x20] sm:$0xff]  ;;  %v240_v3 = vsel %vm239_vm0, %v231_v0, 0.0  ;;  %v236_v5 = vld [vmem:[%s221_s24 + $0x28] sm:$0xff]  ;;  %v243_v6 = vsel %vm239_vm0, %v232_v2, 0.0  ;;  %v234_v9 = vld [vmem:[%s221_s24 + $0x18] sm:$0xff]  ;;  %v246_v10 = vsel %vm239_vm0, %v233_v8, 0.0 }
  0x12   : > { %v252_v4 = vsel %vm239_vm0, %v235_v1, 0.0  ;;  %241 = vadd.xlane.f32.xlu0 %v240_v3  ;;  %v255_v7 = vsel %vm239_vm0, %v236_v5, 0.0  ;;  %v249_v11 = vsel %vm239_vm0, %v234_v9, 0.0  ;;  %v237_v12 = vld [vmem:[%s221_s24 + $0x30] sm:$0xff]  ;;  %v238_v13 = vld [vmem:[%s221_s24 + $0x38] sm:$0xff] }
  0x13   : > { %253 = vadd.xlane.f32.xlu1 %v252_v4  ;;  %v258_v14 = vsel %vm239_vm0, %v237_v12, 0.0  ;;  %v261_v15 = vsel %vm239_vm0, %v238_v13, 0.0 }
  0x16   : > { %244 = vadd.xlane.f32.xlu0 %v243_v6 }
  0x17   : > { %256 = vadd.xlane.f32.xlu1 %v255_v7 }
  0x1a   : > { %247 = vadd.xlane.f32.xlu0 %v246_v10 }
  0x1b   : > { %250 = vadd.xlane.f32.xlu1 %v249_v11 }
  0x1e   : > { %259 = vadd.xlane.f32.xlu0 %v258_v14 }
  0x1f   : > { %262 = vadd.xlane.f32.xlu1 %v261_v15 }
  0x9f   : > { %v242_v16 = vpop.xlane.xlu0 %241 }
  0xa0   : > { %v254_v17 = vpop.xlane.xlu1 %253  ;;  %v265_v18 = vmul.f32 0.020833334, %v242_v16 }
  0xa1   : > { %v269_v19 = vmul.f32 0.020833334, %v254_v17 }
  0xa2   : > { %v713_v20 = vsub.f32 %v231_v0, %v265_v18 }
  0xa3   : > { %v715_v21 = vsub.f32 %v235_v1, %v269_v19  ;;  %v245_v22 = vpop.xlane.xlu0 %244 }
  0xa4   : > { %v257_v23 = vpop.xlane.xlu1 %256  ;;  %v266_v24 = vmul.f32 0.020833334, %v245_v22  ;;  %v281_v26 = vmul.f32 %v713_v20, %v713_v20 }
  0xa5   : > { %v270_v25 = vmul.f32 0.020833334, %v257_v23  ;;  %v285_v27 = vmul.f32 %v715_v21, %v715_v21 }
  0xa6   : > { %v721_v28 = vsub.f32 %v232_v2, %v266_v24  ;;  %v289_v30 = vsel %vm239_vm0, %v281_v26, 0.0  ;;  %v597_v26 = vld [vmem:[%s830_s1] ss:$0 sm:$0xff] }
  0xa7   : > { %v723_v29 = vsub.f32 %v236_v5, %v270_v25  ;;  %290 = vadd.xlane.f32.xlu0 %v289_v30  ;;  %v248_v31 = vpop.xlane.xlu0 %247  ;;  %v301_v33 = vsel %vm239_vm0, %v285_v27, 0.0 }
  0xa8   : > { %v251_v32 = vpop.xlane.xlu1 %250  ;;  %v267_v34 = vmul.f32 0.020833334, %v248_v31  ;;  %v282_v36 = vmul.f32 %v721_v28, %v721_v28 }
  0xa9   : > { %v268_v35 = vmul.f32 0.020833334, %v251_v32  ;;  %v286_v37 = vmul.f32 %v723_v29, %v723_v29 }
  0xaa   : > { %v731_v38 = vsub.f32 %v233_v8, %v267_v34  ;;  %v292_v40 = vsel %vm239_vm0, %v282_v36, 0.0 }
  0xab   : > { %v733_v39 = vsub.f32 %v234_v9, %v268_v35  ;;  %302 = vadd.xlane.f32.xlu0 %v301_v33  ;;  %293 = vadd.xlane.f32.xlu1 %v292_v40  ;;  %v260_v41 = vpop.xlane.xlu0 %259  ;;  %v304_v43 = vsel %vm239_vm0, %v286_v37, 0.0 }
  0xac   : > { %v263_v42 = vpop.xlane.xlu1 %262  ;;  %v271_v44 = vmul.f32 0.020833334, %v260_v41  ;;  %v283_v46 = vmul.f32 %v731_v38, %v731_v38 }
  0xad   : > { %v272_v45 = vmul.f32 0.020833334, %v263_v42  ;;  %v284_v47 = vmul.f32 %v733_v39, %v733_v39 }
  0xae   : > { %v741_v48 = vsub.f32 %v237_v12, %v271_v44  ;;  %v295_v50 = vsel %vm239_vm0, %v283_v46, 0.0 }
  0xaf   : > { %v743_v49 = vsub.f32 %v238_v13, %v272_v45  ;;  %305 = vadd.xlane.f32.xlu1 %v304_v43  ;;  %296 = vadd.xlane.f32.xlu0 %v295_v50  ;;  %v298_v51 = vsel %vm239_vm0, %v284_v47, 0.0 }
  0xb0   : > { %v287_v52 = vmul.f32 %v741_v48, %v741_v48 }
  0xb1   : > { %v288_v53 = vmul.f32 %v743_v49, %v743_v49 }
  0xb2   : > { %v307_v54 = vsel %vm239_vm0, %v287_v52, 0.0 }
  0xb3   : > { %299 = vadd.xlane.f32.xlu1 %v298_v51  ;;  %308 = vadd.xlane.f32.xlu0 %v307_v54  ;;  %v310_v55 = vsel %vm239_vm0, %v288_v53, 0.0 }
  0xb7   : > { %311 = vadd.xlane.f32.xlu1 %v310_v55 }
 0x134   : > { %v291_v63 = vpop.xlane.xlu0 %290 }
 0x135   : > { %v313_v0 = vmul.f32 0.020833334, %v291_v63  ;;  %v387_v63 = vlaneseq }
 0x137   : > { %v321_v1 = vadd.f32 1e-06, %v313_v0  ;;  %v388_v0 = vshrl.u32 %v387_v63, 7 }
 0x138   : > { %v294_v2 = vpop.xlane.xlu1 %293  ;;  %v303_v3 = vpop.xlane.xlu0 %302 }
 0x139   : > { %636 = vrsqrt.f32 %v321_v1  ;;  %v314_v4 = vmul.f32 0.020833334, %v294_v2  ;;  %v317_v5 = vmul.f32 0.020833334, %v303_v3  ;;  %v385_v1 = vld [vmem:[%s833_s4] sm:$0x3] }
 0x13a   : > { %v393_v2 = vsub.s32 1, %v388_v0 }
 0x13b   : > { %v322_v6 = vadd.f32 1e-06, %v314_v4  ;;  %v325_v7 = vadd.f32 1e-06, %v317_v5 }
 0x13c   : > { %v306_v8 = vpop.xlane.xlu1 %305  ;;  %v297_v9 = vpop.xlane.xlu0 %296 }
 0x13d   : > { %638 = vrsqrt.f32 %v322_v6  ;;  %v318_v10 = vmul.f32 0.020833334, %v306_v8  ;;  %v315_v11 = vmul.f32 0.020833334, %v297_v9 }
 0x13e   : > { %640 = vrsqrt.f32 %v325_v7 }
 0x13f   : > { %v326_v12 = vadd.f32 1e-06, %v318_v10  ;;  %v323_v13 = vadd.f32 1e-06, %v315_v11 }
 0x140   : > { %v300_v14 = vpop.xlane.xlu1 %299  ;;  %v309_v15 = vpop.xlane.xlu0 %308 }
 0x141   : > { %642 = vrsqrt.f32 %v326_v12  ;;  %v316_v16 = vmul.f32 0.020833334, %v300_v14  ;;  %v319_v17 = vmul.f32 0.020833334, %v309_v15 }
 0x142   : > { %644 = vrsqrt.f32 %v323_v13 }
 0x143   : > { %v637_v18 = vpop.eup %636  ;;  %v324_v19 = vadd.f32 1e-06, %v316_v16  ;;  %v327_v22 = vadd.f32 1e-06, %v319_v17 }
 0x144   : > { %v337_v23 = vmul.f32 %v637_v18, %v713_v20  ;;  %v312_v24 = vpop.xlane.xlu1 %311  ;;  %v598_v20 = vld [vmem:[%s831_s2] ss:$0 sm:$0xff] }
 0x145   : > { %646 = vrsqrt.f32 %v324_v19  ;;  %v320_v25 = vmul.f32 0.020833334, %v312_v24 }
 0x146   : > { %648 = vrsqrt.f32 %v327_v22  ;;  %v352_v33 = vmul.f32 %v597_v26, %v337_v23 }
 0x147   : > { %v639_v27 = vpop.eup %638  ;;  %v328_v30 = vadd.f32 1e-06, %v320_v25 }
 0x148   : > { %v641_v31 = vpop.eup %640  ;;  %v338_v32 = vmul.f32 %v639_v27, %v721_v28  ;;  %v367_v41 = vadd.f32 %v598_v20, %v352_v33 }
 0x149   : > { %v341_v34 = vmul.f32 %v641_v31, %v715_v21  ;;  %650 = vrsqrt.f32 %v328_v30 }
 0x14a   : > { %v353_v35 = vmul.f32 %v597_v26, %v338_v32 }
 0x14b   : > { %v643_v36 = vpop.eup %642  ;;  %v356_v43 = vmul.f32 %v597_v26, %v341_v34 }
 0x14c   : > { %v645_v37 = vpop.eup %644  ;;  %v342_v40 = vmul.f32 %v643_v36, %v723_v29  ;;  %v368_v42 = vadd.f32 %v598_v20, %v353_v35 }
 0x14d   : > { %v339_v44 = vmul.f32 %v645_v37, %v731_v38  ;;  %v371_v50 = vadd.f32 %v598_v20, %v356_v43 }
 0x14e   : > { %v375_v45 = vpack.c.bf16 %v368_v42, %v367_v41  ;;  %v357_v28 = vmul.f32 %v597_v26, %v342_v40 }
 0x14f   : > { %v647_v46 = vpop.eup %646  ;;  %v354_v52 = vmul.f32 %v597_v26, %v339_v44 }
 0x150   : > { %v649_v47 = vpop.eup %648  ;;  %v340_v21 = vmul.f32 %v647_v46, %v733_v39  ;;  %605 = vmatmul.mubr.msk.bf16.vlgmr.msra.gmra.mrb[0].mxu0 %vm239_vm0, %v375_v45  ;;  %v372_v51 = vadd.f32 %v598_v20, %v357_v28 }
 0x151   : > { %v343_v53 = vmul.f32 %v649_v47, %v741_v48  ;;  %481 = vmatprep.mubr.bf16.mxu0 %v660_v62  ;;  %v369_v56 = vadd.f32 %v598_v20, %v354_v52 }
 0x152   : > { %v377_v29 = vpack.c.bf16 %v372_v51, %v371_v50  ;;  %v355_v54 = vmul.f32 %v597_v26, %v340_v21 }
 0x153   : > { %v651_v55 = vpop.eup %650  ;;  %v358_v39 = vmul.f32 %v597_v26, %v343_v53 }
 0x154   : > { %v344_v38 = vmul.f32 %v651_v55, %v743_v49  ;;  %607 = vmatmul.mubr.msk.bf16.vlgmr.msra.gmra.mrb[0].mxu1 %vm239_vm0, %v377_v29  ;;  %v370_v57 = vadd.f32 %v598_v20, %v355_v54  ;;  %v389_v49 = vsub.s32 0, %v388_v0 }
 0x155   : > { %501 = vmatprep.mubr.bf16.mxu1 %v660_v62  ;;  %v373_v48 = vadd.f32 %v598_v20, %v358_v39  ;;  %v394_v62 = vrot.slane %v385_v1, %v393_v2 }
 0x156   : > { %v376_v58 = vpack.c.bf16 %v370_v57, %v369_v56  ;;  %v359_v59 = vmul.f32 %v597_v26, %v344_v38  ;;  %v390_v3 = vrot.slane %v385_v1, %v389_v49 }
 0x158   : > { %606 = vmatmul.mubr.msk.bf16.gmra.mrb[4].mxu0 %vm239_vm0, %v376_v58  ;;  %v374_v60 = vadd.f32 %v598_v20, %v359_v59 }
 0x15a   : > { %v378_v61 = vpack.c.bf16 %v374_v60, %v373_v48 }
 0x15c   : > { %608 = vmatmul.mubr.msk.bf16.gmra.mrb[4].mxu1 %vm239_vm0, %v378_v61 }
 0x223   : > { %v473_v4 = vpop.f32.mrb[0].mxu0 }
 0x224   : > { %v474_v5 = vadd.f32 %v473_v4, %v390_v3  ;;  %v475_v6 = vpop.f32.mrb[1].mxu0 }
 0x225   : > { %v476_v7 = vadd.f32 %v475_v6, %v394_v62  ;;  %v477_v8 = vpop.f32.mrb[2].mxu0 }
 0x226   : > { %512 = vst [vmem:[%s800_s23] sm:$0xff] %v474_v5  ;;  %v478_v9 = vadd.f32 %v477_v8, %v390_v3  ;;  %v479_v10 = vpop.f32.mrb[3].mxu0 }
 0x227   : > { %514 = vst.msk [vmem:[%s800_s23 + $0x8] sm:$0xff] %vm513_vm1, %v476_v7  ;;  %v480_v11 = vadd.f32 %v479_v10, %v394_v62  ;;  %v493_v12 = vpop.f32.mrb[0].mxu1 }
 0x228   : > { %515 = vst [vmem:[%s800_s23 + $0x10] sm:$0xff] %v478_v9  ;;  %v494_v13 = vadd.f32 %v493_v12, %v390_v3  ;;  %v495_v14 = vpop.f32.mrb[1].mxu1 }
 0x229   : > { %516 = vst.msk [vmem:[%s800_s23 + $0x18] sm:$0xff] %vm513_vm1, %v480_v11  ;;  %v496_v15 = vadd.f32 %v495_v14, %v394_v62  ;;  %v497_v16 = vpop.f32.mrb[2].mxu1 }
 0x22a   : > { %521 = vst [vmem:[%s800_s23 + $0x40] sm:$0xff] %v494_v13  ;;  %v498_v17 = vadd.f32 %v497_v16, %v390_v3  ;;  %v499_v18 = vpop.f32.mrb[3].mxu1 }
 0x22b   : > { %522 = vst.msk [vmem:[%s800_s23 + $0x48] sm:$0xff] %vm513_vm1, %v496_v15  ;;  %v500_v19 = vadd.f32 %v499_v18, %v394_v62  ;;  %v483_v22 = vpop.f32.mrb[4].mxu0 }
 0x22c   : > { %523 = vst [vmem:[%s800_s23 + $0x50] sm:$0xff] %v498_v17  ;;  %v484_v23 = vadd.f32 %v483_v22, %v390_v3  ;;  %v485_v24 = vpop.f32.mrb[5].mxu0 }
 0x22d   : > { %524 = vst.msk [vmem:[%s800_s23 + $0x58] sm:$0xff] %vm513_vm1, %v500_v19  ;;  %v486_v25 = vadd.f32 %v485_v24, %v394_v62  ;;  %v487_v26 = vpop.f32.mrb[6].mxu0 }
 0x22e   : > { %517 = vst [vmem:[%s800_s23 + $0x20] sm:$0xff] %v484_v23  ;;  %v488_v27 = vadd.f32 %v487_v26, %v390_v3  ;;  %v489_v30 = vpop.f32.mrb[7].mxu0 }
 0x22f   : > { %518 = vst.msk [vmem:[%s800_s23 + $0x28] sm:$0xff] %vm513_vm1, %v486_v25  ;;  %v490_v31 = vadd.f32 %v489_v30, %v394_v62  ;;  %v503_v32 = vpop.f32.mrb[4].mxu1 }
 0x230   : > { %519 = vst [vmem:[%s800_s23 + $0x30] sm:$0xff] %v488_v27  ;;  %v504_v33 = vadd.f32 %v503_v32, %v390_v3  ;;  %v505_v34 = vpop.f32.mrb[5].mxu1 }
 0x231   : > { %520 = vst.msk [vmem:[%s800_s23 + $0x38] sm:$0xff] %vm513_vm1, %v490_v31  ;;  %v506_v20 = vadd.f32 %v505_v34, %v394_v62  ;;  %v507_v35 = vpop.f32.mrb[6].mxu1 }
 0x232   : > { %525 = vst [vmem:[%s800_s23 + $0x60] sm:$0xff] %v504_v33  ;;  %v508_v36 = vadd.f32 %v507_v35, %v390_v3  ;;  %v509_v37 = vpop.f32.mrb[7].mxu1 }
 0x233   : > { %526 = vst.msk [vmem:[%s800_s23 + $0x68] sm:$0xff] %vm513_vm1, %v506_v20  ;;  %v510_v40 = vadd.f32 %v509_v37, %v394_v62 }
 0x234   : > { %527 = vst [vmem:[%s800_s23 + $0x70] sm:$0xff] %v508_v36 }
 0x235   : > { %528 = vst.msk [vmem:[%s800_s23 + $0x78] sm:$0xff] %vm513_vm1, %v510_v40 }
 0x236 PF: > { %s15_s18 = sadd.s32 1, %s658_s18  }
 0x237   : > { %p12_p4 = scmp.ge.s32.totalorder %s15_s18, 4  }
 0x239   :  { %14 = sbr.rel (!%p12_p4) target bundleno = 1 (0x1), region = 70 }

</bundles_post_ra>
